<compile_context>
chip_gen: v5e
topology: v5e:2x2
jax: 0.10.0
libtpu: 0.0.40
codegen_flags: <defaults>
</compile_context>

<pallas_src>
import functools

import jax
import jax.numpy as jnp
from jax.experimental import pallas as pl
from jax.experimental.pallas import tpu as pltpu


_LANE = 128       # lane width: hidden/output feature dims pad to this
_SUB_BF16 = 16    # bf16 sublane tile: batch tiles & input feature dim pad to this


def _round_up(n, m):
    return ((n + m - 1) // m) * m


def _qnet_kernel(x_ref, w1_ref, b1_ref, w2_ref, b2_ref, o_ref):
    """One batch tile of relu(x @ W1 + b1) @ W2 + b2.

    x_ref : (bt, U16)  bf16  -- batch tile, input features padded to 16 only
    w1_ref: (U16, Hp)  bf16  -- constant block index -> DMA'd once, VMEM-resident
    b1_ref: (1, Hp)    f32
    w2_ref: (Hp, Op)   bf16
    b2_ref: (1, Op)    f32
    o_ref : (bt, Op)   bf16  -- lane-dense (128-wide) unmasked store
    """
    # Layer 1: bf16 MXU matmul, f32 accumulation; bias + ReLU in f32 on the VPU.
    h = jnp.dot(x_ref[...], w1_ref[...], preferred_element_type=jnp.float32)
    h = jnp.maximum(h + b1_ref[...], 0.0)
    # Layer 2: explicit bf16 downcast of activations for the MXU.
    o = jnp.dot(h.astype(jnp.bfloat16), w2_ref[...],
                preferred_element_type=jnp.float32)
    o_ref[...] = (o + b2_ref[...]).astype(o_ref.dtype)


def prepare_params(w1, b1, w2, b2):
    """Pad & cast Linear_QNet params once; reuse across forward calls.

    w1: (UNOS, SKRIVEN) pre-transposed, b1: (SKRIVEN,),
    w2: (SKRIVEN, IZLAZ) pre-transposed, b2: (IZLAZ,).
    Weights -> bf16 (MXU operands); biases stay f32 for torch parity.
    """
    unos, skriven = w1.shape
    izlaz = w2.shape[1]
    u16 = _round_up(unos, _SUB_BF16)
    hp = _round_up(skriven, _LANE)
    op = _round_up(izlaz, _LANE)

    w1p = jnp.zeros((u16, hp), jnp.bfloat16).at[:unos, :skriven].set(
        w1.astype(jnp.bfloat16))
    b1p = jnp.zeros((1, hp), jnp.float32).at[0, :skriven].set(
        jnp.reshape(b1, (-1,)).astype(jnp.float32))
    w2p = jnp.zeros((hp, op), jnp.bfloat16).at[:skriven, :izlaz].set(
        w2.astype(jnp.bfloat16))
    b2p = jnp.zeros((1, op), jnp.float32).at[0, :izlaz].set(
        jnp.reshape(b2, (-1,)).astype(jnp.float32))
    return (w1p, b1p, w2p, b2p), izlaz


def _choose_bt(batch, block_b):
    """Pick the batch tile.

    Multiple of 16 (bf16 sublane tile).  For large batches: multiples of 256
    and capped at ceil(batch/2) so there are >= 2 grid steps and both of
    v7x's TensorCores get work ("parallel" batch axis)."""
    b_aln = _round_up(batch, _SUB_BF16)
    if b_aln <= 2 * 256:
        bt = _round_up(min(block_b, b_aln), _SUB_BF16)
    else:
        half = _round_up(pl.cdiv(b_aln, 2), 256)
        bt = _round_up(min(block_b, half), 256)
    b_pad = _round_up(b_aln, bt)
    return bt, b_pad


@functools.partial(jax.jit, static_argnames=("izlaz", "block_b", "out_dtype"))
def linear_qnet_forward_prepared(x, w1p, b1p, w2p, b2p, *, izlaz,
                                 block_b=4096, out_dtype=jnp.bfloat16):
    """x: (B, UNOS) float. Params from prepare_params. Returns (B, IZLAZ)."""
    B, unos = x.shape
    u16, hp = w1p.shape
    op = w2p.shape[1]
    assert unos <= u16, "input feature dim mismatch"

    bt, b_pad = _choose_bt(B, block_b)
    n_steps = b_pad // bt

    # bf16 cast; pad rows to the tile multiple and features only to 16 (NOT 128:
    # the kernel is HBM/overhead bound, keep the x stream ~8x smaller).
    x_p = jnp.zeros((b_pad, u16), jnp.bfloat16).at[:B, :unos].set(
        x.astype(jnp.bfloat16))

    flops = 2 * b_pad * (u16 * hp + hp * op)
    bytes_accessed = (x_p.size * 2 + w1p.size * 2 + w2p.size * 2
                      + (b1p.size + b2p.size) * 4
                      + b_pad * op * jnp.dtype(out_dtype).itemsize)

    out = pl.pallas_call(
        _qnet_kernel,
        out_shape=jax.ShapeDtypeStruct((b_pad, op), out_dtype),
        grid=(n_steps,),
        in_specs=[
            # Batch tile of activations.
            pl.BlockSpec((bt, u16), lambda i: (i, 0)),
            # Parameters: constant block index -> fetched once, VMEM-resident
            # across all grid steps (no per-step slicing inside the kernel).
            pl.BlockSpec((u16, hp), lambda i: (0, 0)),
            pl.BlockSpec((1, hp), lambda i: (0, 0)),
            pl.BlockSpec((hp, op), lambda i: (0, 0)),
            pl.BlockSpec((1, op), lambda i: (0, 0)),
        ],
        out_specs=pl.BlockSpec((bt, op), lambda i: (i, 0)),   # lane-dense store
        compiler_params=pltpu.CompilerParams(
            dimension_semantics=("parallel",),    # batch axis across TCs on v7x
            vmem_limit_bytes=32 * 1024 * 1024,    # safe on v7x's 64 MiB physical
        ),
        cost_estimate=pl.CostEstimate(
            flops=flops, transcendentals=0, bytes_accessed=bytes_accessed),
    )(x_p, w1p, b1p, w2p, b2p)

    return out[:B, :izlaz]


def linear_qnet_forward(x, w1, b1, w2, b2, *, block_b=4096,
                        out_dtype=jnp.bfloat16):
    """Convenience wrapper: prepares params and runs the forward pass."""
    params, izlaz = prepare_params(w1, b1, w2, b2)
    squeeze = (x.ndim == 1)
    if squeeze:
        x = x[None, :]
    out = linear_qnet_forward_prepared(x, *params, izlaz=izlaz,
                                       block_b=block_b, out_dtype=out_dtype)
    return out[0] if squeeze else out


def init_params(key, unos, skriven, izlaz):
    """Deterministic init mimicking nn.Linear default (uniform +-1/sqrt(fan_in)).
    Weights are stored pre-transposed as (in, out); biases are 1-D."""
    k1, k2, k3, k4 = jax.random.split(key, 4)
    bound1 = 1.0 / jnp.sqrt(unos)
    bound2 = 1.0 / jnp.sqrt(skriven)
    w1 = jax.random.uniform(k1, (unos, skriven), jnp.float32, -bound1, bound1)
    b1 = jax.random.uniform(k2, (skriven,), jnp.float32, -bound1, bound1)
    w2 = jax.random.uniform(k3, (skriven, izlaz), jnp.float32, -bound2, bound2)
    b2 = jax.random.uniform(k4, (izlaz,), jnp.float32, -bound2, bound2)
    return w1, b1, w2, b2


# TODO(synk): Linear_QNet.save (torch.save checkpoint I/O) is host-side and has
# no kernel equivalent; it is intentionally not implemented here.

if __name__ == "__main__":
    # Shapes consistent with Linear_QNet(UNOS, SKRIVEN, IZLAZ); small batch that
    # still exercises the parallel batch grid (2 tiles of 32 rows).
    UNOS_LAYER, SKRIVEN_LAYER, IZLAZ_LAYER = 16, 32, 4
    BATCH = 64

    key = jax.random.PRNGKey(0)
    kx, kp = jax.random.split(key)
    x = jax.random.normal(kx, (BATCH, UNOS_LAYER), jnp.float32)
    w1, b1, w2, b2 = init_params(kp, UNOS_LAYER, SKRIVEN_LAYER, IZLAZ_LAYER)

    params, izlaz = prepare_params(w1, b1, w2, b2)      # pad/cast once, reuse
    out = linear_qnet_forward_prepared(x, *params, izlaz=izlaz, block_b=32)
    out = jax.block_until_ready(out)

    bf, f32 = jnp.bfloat16, jnp.float32
    out_f32 = out.astype(f32)

    # Reference 1: same math with matching bf16 MXU operands, f32 biases
    # (kernel differs only by the final bf16 output cast -> tight tolerance).
    h_ref = jnp.maximum(
        jnp.dot(x.astype(bf), w1.astype(bf), preferred_element_type=f32) + b1,
        0.0)
    ref_mx = (jnp.dot(h_ref.astype(bf), w2.astype(bf),
                      preferred_element_type=f32) + b2)
    # Reference 2: pure f32 PyTorch-style forward (loose tolerance for bf16).
    ref_f32 = jnp.maximum(x @ w1 + b1, 0.0) @ w2 + b2

    assert out.shape == (BATCH, IZLAZ_LAYER)
    assert out.dtype == jnp.bfloat16
    assert jnp.allclose(out_f32, ref_mx, atol=1e-2, rtol=1e-2)
    assert jnp.allclose(out_f32, ref_f32, atol=5e-2, rtol=5e-2)

    print("KERNEL_OK")
</pallas_src>

<mosaic_0001>
module attributes {stable_mosaic.version = 11 : i64} {
  func.func @_qnet_kernel(%arg0: i32, %arg1: memref<32x16xbf16, #tpu.memory_space<vmem>>, %arg2: memref<16x128xbf16, #tpu.memory_space<vmem>>, %arg3: memref<1x128xf32, #tpu.memory_space<vmem>>, %arg4: memref<128x128xbf16, #tpu.memory_space<vmem>>, %arg5: memref<1x128xf32, #tpu.memory_space<vmem>>, %arg6: memref<32x128xbf16, #tpu.memory_space<vmem>>) attributes {dimension_semantics = [#tpu.dimension_semantics<parallel>], iteration_bounds = array<i64: 2>, scalar_prefetch = 0 : i64, scratch_operands = 0 : i64, tpu.core_type = #tpu.core_type<tc>, window_params = [{transform_indices = @transform_0, window_bounds = array<i64: 32, 16>}, {pipeline_mode = #tpu.pipeline_mode<synchronous>, transform_indices = @transform_1, window_bounds = array<i64: 16, 128>}, {pipeline_mode = #tpu.pipeline_mode<synchronous>, transform_indices = @transform_2, window_bounds = array<i64: 1, 128>}, {pipeline_mode = #tpu.pipeline_mode<synchronous>, transform_indices = @transform_3, window_bounds = array<i64: 128, 128>}, {pipeline_mode = #tpu.pipeline_mode<synchronous>, transform_indices = @transform_4, window_bounds = array<i64: 1, 128>}, {transform_indices = @transform_5, window_bounds = array<i64: 32, 128>}]} {
    %c0 = arith.constant 0 : index
    %c0_0 = arith.constant 0 : index
    %0 = vector.load %arg1[%c0, %c0_0] : memref<32x16xbf16, #tpu.memory_space<vmem>>, vector<32x16xbf16>
    %c0_1 = arith.constant 0 : index
    %c0_2 = arith.constant 0 : index
    %1 = vector.load %arg2[%c0_1, %c0_2] : memref<16x128xbf16, #tpu.memory_space<vmem>>, vector<16x128xbf16>
    %cst = arith.constant dense<0.000000e+00> : vector<32x128xf32>
    %2 = tpu.matmul %0, %1, %cst {dimension_numbers = #tpu.dot_dimension_numbers<[1], [0], [0], [1], [0, 0, 1, 1], [], []>} : vector<32x16xbf16>, vector<16x128xbf16>, vector<32x128xf32> -> vector<32x128xf32>
    %c0_3 = arith.constant 0 : index
    %c0_4 = arith.constant 0 : index
    %3 = vector.load %arg3[%c0_3, %c0_4] : memref<1x128xf32, #tpu.memory_space<vmem>>, vector<1x128xf32>
    %4 = vector.broadcast %3 : vector<1x128xf32> to vector<32x128xf32>
    %5 = arith.addf %2, %4 : vector<32x128xf32>
    %cst_5 = arith.constant 0.000000e+00 : f32
    %6 = vector.broadcast %cst_5 : f32 to vector<32x128xf32>
    %7 = arith.maximumf %5, %6 : vector<32x128xf32>
    %8 = arith.truncf %7 : vector<32x128xf32> to vector<32x128xbf16>
    %c0_6 = arith.constant 0 : index
    %c0_7 = arith.constant 0 : index
    %9 = vector.load %arg4[%c0_6, %c0_7] : memref<128x128xbf16, #tpu.memory_space<vmem>>, vector<128x128xbf16>
    %cst_8 = arith.constant dense<0.000000e+00> : vector<32x128xf32>
    %10 = tpu.matmul %8, %9, %cst_8 {dimension_numbers = #tpu.dot_dimension_numbers<[1], [0], [0], [1], [0, 0, 1, 1], [], []>} : vector<32x128xbf16>, vector<128x128xbf16>, vector<32x128xf32> -> vector<32x128xf32>
    %c0_9 = arith.constant 0 : index
    %c0_10 = arith.constant 0 : index
    %11 = vector.load %arg5[%c0_9, %c0_10] : memref<1x128xf32, #tpu.memory_space<vmem>>, vector<1x128xf32>
    %12 = vector.broadcast %11 : vector<1x128xf32> to vector<32x128xf32>
    %13 = arith.addf %10, %12 : vector<32x128xf32>
    %14 = arith.truncf %13 : vector<32x128xf32> to vector<32x128xbf16>
    %c0_11 = arith.constant 0 : index
    %c0_12 = arith.constant 0 : index
    %15 = vector.load %arg6[%c0_11, %c0_12] : memref<32x128xbf16, #tpu.memory_space<vmem>>, vector<32x128xbf16>
    tpu.vector_store %arg6[%c0_11, %c0_12], %14 {strides = array<i32>} : memref<32x128xbf16, #tpu.memory_space<vmem>>, vector<32x128xbf16>,
    return
  }
  func.func @transform_0(%arg0: i32) -> (i32, i32) {
    %c0_i32 = arith.constant 0 : i32
    %c0_i32_0 = arith.constant 0 : i32
    return %arg0, %c0_i32 : i32, i32
  }
  func.func @transform_1(%arg0: i32) -> (i32, i32) {
    %c0_i32 = arith.constant 0 : i32
    %c0_i32_0 = arith.constant 0 : i32
    %c0_i32_1 = arith.constant 0 : i32
    return %c0_i32, %c0_i32_0 : i32, i32
  }
  func.func @transform_2(%arg0: i32) -> (i32, i32) {
    %c0_i32 = arith.constant 0 : i32
    %c0_i32_0 = arith.constant 0 : i32
    %c0_i32_1 = arith.constant 0 : i32
    return %c0_i32, %c0_i32_0 : i32, i32
  }
  func.func @transform_3(%arg0: i32) -> (i32, i32) {
    %c0_i32 = arith.constant 0 : i32
    %c0_i32_0 = arith.constant 0 : i32
    %c0_i32_1 = arith.constant 0 : i32
    return %c0_i32, %c0_i32_0 : i32, i32
  }
  func.func @transform_4(%arg0: i32) -> (i32, i32) {
    %c0_i32 = arith.constant 0 : i32
    %c0_i32_0 = arith.constant 0 : i32
    %c0_i32_1 = arith.constant 0 : i32
    return %c0_i32, %c0_i32_0 : i32, i32
  }
  func.func @transform_5(%arg0: i32) -> (i32, i32) {
    %c0_i32 = arith.constant 0 : i32
    %c0_i32_0 = arith.constant 0 : i32
    return %arg0, %c0_i32 : i32, i32
  }
}

</mosaic_0001>

<bundles_post_ra>
// kernel: linear_qnet_forward_prepared.1
= control target key start
LH: loop header
LB: loop body
LE: loop exit
PB: predicated region body
PF: predicated region fallthrough
CT: control target
= control target key end

     0   :  { %10 = vsyncpa [#allocation3], 0  ;;  %s654_s18 = smov 0   ;;  %s711_s0 = inlined_call_operand.vmem [shape: bf16[64,16], index: 0, kind: input, shape index: {}]   ;;  %s712_s1 = inlined_call_operand.hbm [shape: bf16[16,128], index: 1, kind: input, shape index: {}]   ;;  %s713_s2 = inlined_call_operand.vmem [shape: f32[1,128], index: 2, kind: input, shape index: {}]   ;;  %s714_s3 = inlined_call_operand.vmem [shape: bf16[128,128], index: 3, kind: input, shape index: {}]   ;;  %s715_s4 = inlined_call_operand.vmem [shape: f32[1,128], index: 4, kind: input, shape index: {}]   ;;  %s716_s5 = inlined_call_operand.vmem [shape: bf16[64,128], index: 5, kind: output, shape index: {}]  }
   0x1 LB: > { %s168_s21 = sshll.u32 %s712_s1, 4  ;;  %s467_s22 = sadd.s32 4294967295, %s619_s18   ;;  %s619_s18 = sphi %s654_s18, %s16_s18   ;;  %s169_s21 = int_to_ptr.hbm [resolvable:$true] %s168_s21 }
   0x2   : > { %p469_p0 = scmp.ge.s32.totalorder %s619_s18, 1  ;;  %p157_p1 = scmp.lt.s32.totalorder %s619_s18, 3 }
   0x3   : > { %p564_p2 = scmp.eq.s32.totalorder %s467_s22, 0  ;;  %s621_s23 = smov [#allocation2]  }
   0x4   : > { %p158_p3 = pnand %p469_p0, %p157_p1  ;;  %s170_s24 = sshll.u32 %s621_s23, 4  ;;  %s171_s24 = int_to_ptr.vmem [resolvable:$true] %s170_s24 }
   0x5   : > { %s622_s25 = smov 64   ;;  %s623_s26 = smov 4  }
   0x6   : > { %p560_p4 = pneg %p158_p3  ;;  %204 = sbr.rel (%p158_p3) target bundleno = 320 (0x140), region = 40 }
   0x8   : > { %p561_p5 = pnand %p564_p2, %p560_p4 }
   0xa   : > { %563 = dma.hbm_to_vmem [thread:$0]  (!%p561_p5), %s169_s21, 128, %s171_s24, [#allocation3], %s622_s25, %s622_s25, %s623_s26  }
   0xb   : > { %614 = dma.done.wait (%p564_p2), [#allocation3], 128  }
   0xc   : > { %616 = vsyncadd (%p564_p2), [#allocation3], 4294967168  ;;  %s474_s27 = sshll.u32 %s467_s22, 2  ;;  %v528_v0 = vld [vmem:[#allocation2] sm:$0xff]  ;;  %v536_v2 = vld [vmem:[%s714_s3 + $0x38] sm:$0xff]  ;;  %vm272_vm0 = vcmask 130048  }
   0xd   : > { %p234_p6 = scmp.lt.s32.totalorder %s474_s27, 7  ;;  %286 = vmatpush.bf16.msra.mxu0 %v528_v0  ;;  %372 = vmatpush.bf16.msra.mxu1 %v536_v2  ;;  %v535_v3 = vld [vmem:[%s714_s3 + $0x30] sm:$0xff]  ;;  %v534_v4 = vld [vmem:[%s714_s3 + $0x28] sm:$0xff]  ;;  %v533_v5 = vld [vmem:[%s714_s3 + $0x20] sm:$0xff] }
   0xe   : > { %548 = vmatpush.bf16.msra.mxu2 %v536_v2  ;;  %v532_v7 = vld [vmem:[%s714_s3 + $0x18] sm:$0xff]  ;;  %v531_v8 = vld [vmem:[%s714_s3 + $0x10] sm:$0xff]  ;;  %v530_v9 = vld [vmem:[%s714_s3 + $0x8] sm:$0xff] }
   0xf   : > { %s718_s27 = smov (!%p234_p6, %s474_s27), 7  ;;  %v529_v10 = vld [vmem:[%s714_s3] sm:$0xff] }
  0x10   : > { %s475_s28 = sshll.u32 %s718_s27, 2  ;;  %v577_v12 = vld [vmem:[%s713_s2] ss:$0 sm:$0xff] }
  0x11   : > { %s237_s6 = scalar_lea.vmem %s711_s0, %s475_s28  ;;  %373 = vmatpush.bf16.msra.mxu1 %v535_v3  ;;  %v578_v27 = vld [vmem:[%s715_s4] ss:$0 sm:$0xff]  ;;  %s243_s7 = scalar_lea.vmem %s716_s5, %s475_s28 }
  0x12   : > { %v526_v1 = vld [vmem:[%s237_s6] sm:$0xff]  ;;  %549 = vmatpush.bf16.msra.mxu2 %v535_v3  ;;  %v527_v6 = vld [vmem:[%s237_s6 + $0x8] sm:$0xff] }
  0x13   : > { %490 = vmatmul.msk.bf16.vlgmr.msra.gmra.mxu0 %vm272_vm0, %v526_v1 }
  0x15   : > { %374 = vmatpush.bf16.msra.mxu1 %v534_v4 }
  0x16   : > { %550 = vmatpush.bf16.msra.mxu2 %v534_v4 }
  0x19   : > { %375 = vmatpush.bf16.msra.mxu1 %v533_v5 }
  0x1a   : > { %551 = vmatpush.bf16.msra.mxu2 %v533_v5 }
  0x1d   : > { %376 = vmatpush.bf16.msra.mxu1 %v532_v7 }
  0x1e   : > { %552 = vmatpush.bf16.msra.mxu2 %v532_v7 }
  0x21   : > { %377 = vmatpush.bf16.msra.mxu1 %v531_v8 }
  0x22   : > { %553 = vmatpush.bf16.msra.mxu2 %v531_v8 }
  0x23   : > { %491 = vmatmul.msk.bf16.gmra.mxu0 %vm272_vm0, %v527_v6 }
  0x25   : > { %378 = vmatpush.bf16.msra.mxu1 %v530_v9 }
  0x26   : > { %554 = vmatpush.bf16.msra.mxu2 %v530_v9 }
  0x29   : > { %379 = vmatpush.bf16.msra.mxu1 %v529_v10 }
  0x2a   : > { %555 = vmatpush.bf16.msra.mxu2 %v529_v10 }
  0x90   : > { %v288_v11 = vpop.f32.mrf.mxu0 }
  0x91   : > { %v289_v13 = vadd.f32 %v577_v12, %v288_v11 }
  0x93   : > { %v298_v16 = vmax.f32 %v289_v13, 0.0 }
  0x98   : > { %v290_v14 = vpop.f32.mrf.mxu0 }
  0x99   : > { %v291_v15 = vadd.f32 %v577_v12, %v290_v14 }
  0x9b   : > { %v299_v17 = vmax.f32 %v291_v15, 0.0 }
  0x9d   : > { %v302_v18 = vpack.c.bf16 %v299_v17, %v298_v16 }
  0x9f   : > { %380 = vmatmul.bf16.vlgmr.msra.gmra.mxu1 %v302_v18 }
  0xa0   : > { %v293_v19 = vpop.f32.mrf.mxu0 }
  0xa1   : > { %v294_v20 = vadd.f32 %v577_v12, %v293_v19 }
  0xa3   : > { %v300_v23 = vmax.f32 %v294_v20, 0.0 }
  0xa8   : > { %v295_v21 = vpop.f32.mrf.mxu0 }
  0xa9   : > { %v296_v22 = vadd.f32 %v577_v12, %v295_v21 }
  0xab   : > { %v301_v24 = vmax.f32 %v296_v22, 0.0 }
  0xad   : > { %v303_v25 = vpack.c.bf16 %v301_v24, %v300_v23 }
  0xaf   : > { %385 = vmatmul.bf16.vlgmr.msra.gmra.mxu2 %v303_v25 }
 0x11c   : > { %v381_v26 = vpop.f32.mrf.mxu1 }
 0x11d   : > { %v382_v29 = vadd.f32 %v578_v27, %v381_v26 }
 0x124   : > { %v383_v28 = vpop.f32.mrf.mxu1 }
 0x125   : > { %v384_v30 = vadd.f32 %v578_v27, %v383_v28 }
 0x127   : > { %v540_v31 = vpack.c.bf16 %v384_v30, %v382_v29 }
 0x129   : > { %541 = vst [vmem:[%s243_s7] sm:$0xff] %v540_v31  }
 0x132   : > { %v386_v32 = vpop.f32.mrf.mxu2 }
 0x133   : > { %v387_v34 = vadd.f32 %v578_v27, %v386_v32 }
 0x13a   : > { %v388_v33 = vpop.f32.mrf.mxu2 }
 0x13b   : > { %v389_v35 = vadd.f32 %v578_v27, %v388_v33 }
 0x13d   : > { %v545_v36 = vpack.c.bf16 %v389_v35, %v387_v34 }
 0x13f   : > { %547 = vst [vmem:[%s243_s7 + $0x8] sm:$0xff] %v545_v36  }
 0x140 PF: > { %s16_s18 = sadd.s32 1, %s619_s18  }
 0x141   : > { %p13_p7 = scmp.ge.s32.totalorder %s16_s18, 4  }
 0x143   :  { %15 = sbr.rel (!%p13_p7) target bundleno = 1 (0x1), region = 75 }
 0x148   :  { %421 = vsyncpa [#allocation3], 1 }
 0x149   :  { %423 = vsyncpa [#allocation3 + $0x1], 1 }

</bundles_post_ra>
